<compile_context>
chip_gen: v7x
topology: tpu7x:2x2x1
jax: 0.10.0
libtpu: 0.0.40
codegen_flags: <defaults>
</compile_context>

<pallas_src>
import functools

import numpy as np
import jax
import jax.numpy as jnp
from jax import lax
from jax.experimental import pallas as pl
from jax.experimental.pallas import tpu as pltpu

# ----------------------------------------------------------------------------
# Synthetic config (stands in for cfg.local_encoder.* / cfg.feature_dim /
# cfg.classifier.layers / cfg.num_classes).  activation = relu (default).
# ----------------------------------------------------------------------------
IN_CHANNELS = 1  # module asserts in_channels == 1
CONV_LAYERS = (
    dict(out_channels=8, kernel_size=5, stride=2, padding=2),
    dict(out_channels=16, kernel_size=3, stride=2, padding=1),
)
FEATURE_DIM = 32            # cfg.feature_dim
CLASSIFIER_HIDDEN = (64,)   # cfg.classifier hidden sizes
NUM_CLASSES = 6             # cfg.num_classes


def _conv_out_len(t, k, s, p):
    return (t + 2 * p - k) // s + 1


def _round_up(x, m):
    return (x + m - 1) // m * m


# ----------------------------------------------------------------------------
# Pallas kernel: full encoder + classifier forward for one TILE_M lane-slab.
# ----------------------------------------------------------------------------
def _blind_siglab_kernel(conv_meta, in_rows, t_sig, n_fc, x_ref, *refs):
    """
    conv_meta[li] = (T_in, T_out, C_in, C_out, K, stride, padding, TB, nb).
    in_rows[li]   = rows of layer li's padded-input buffer (li==0 -> xs scratch).
    refs ordering:
      per conv layer : wblk (TB*C_out, TB*K*C_in) mxu-dtype, b (C_out, 1) f32
      per fc layer   : w (dout, din) mxu-dtype,   b (dout, 1) f32
      out_ref        : (num_classes, TILE_M) f32, lane-dense
      xs             : (in_rows[0], TILE_M) f32 signal staging scratch
      acts           : 0/1/2 ping-pong padded-activation scratches (rows, C, TILE_M) f32
    """
    n_conv = len(conv_meta)
    pos = 0
    conv_w, conv_b = [], []
    for _ in range(n_conv):
        conv_w.append(refs[pos]); conv_b.append(refs[pos + 1]); pos += 2
    fc_w, fc_b = [], []
    for _ in range(n_fc):
        fc_w.append(refs[pos]); fc_b.append(refs[pos + 1]); pos += 2
    out_ref = refs[pos]; pos += 1
    xs = refs[pos]; pos += 1
    acts = list(refs[pos:])
    n_act = len(acts)

    tm = out_ref.shape[-1]
    f32 = jnp.float32

    # -------- stage the signal: in-kernel transpose (tm, T) -> (T, tm) + halos ----
    # (replaces the wrapper-side XLA transpose, which was a full extra HBM pass)
    p0 = conv_meta[0][6]
    xt = x_ref[...].astype(f32).T                            # (T_pad8, tm) f32
    if p0 > 0:
        xs[0:p0, :] = jnp.zeros((p0, tm), f32)
    xs[p0:p0 + t_sig, :] = xt[0:t_sig, :]
    if in_rows[0] > p0 + t_sig:
        xs[p0 + t_sig:in_rows[0], :] = jnp.zeros((in_rows[0] - p0 - t_sig, tm), f32)

    # -------- conv stack: block-diagonal im2col MXU matmuls for every layer --------
    pooled = None
    for li in range(n_conv):
        (t_in, t_out, c_in, c_out, k, s, p, tb, nb) = conv_meta[li]
        wblk = conv_w[li][...]                               # (tb*c_out, tb*k*c_in)
        b = conv_b[li][...].reshape(1, c_out, 1)             # f32
        is_last = li == n_conv - 1

        if li == 0:
            def read_taps(bi, _k=k, _s=s, _tb=tb):
                taps = []
                for kk in range(_k):
                    start = kk + _s * bi * _tb
                    idx = pl.ds(start, _tb, stride=_s) if _s != 1 else pl.ds(start, _tb)
                    taps.append(xs[idx, :].reshape(_tb, 1, tm))
                return taps
        else:
            src = acts[(li - 1) % n_act]
            def read_taps(bi, _k=k, _s=s, _tb=tb, _ci=c_in, _src=src):
                taps = []
                for kk in range(_k):
                    start = kk + _s * bi * _tb
                    idx = pl.ds(start, _tb, stride=_s) if _s != 1 else pl.ds(start, _tb)
                    taps.append(_src[idx, 0:_ci, :])
                return taps

        if is_last:
            pooled = jnp.zeros((c_out, tm), f32)             # fused mean-pool accum
        else:
            dst = acts[li % n_act]
            p_next = conv_meta[li + 1][6]

        # TODO(synk): switch this static block loop to lax.fori_loop(unroll=few)
        # when nb gets large at long signal lengths (bounds vreg live ranges).
        for bi in range(nb):
            # per-block im2col slab, built on the fly (no full `cols` buffer)
            slab = jnp.concatenate(read_taps(bi), axis=1)    # (tb, k*c_in, tm)
            slab = slab.reshape(tb * k * c_in, tm)
            o = jnp.dot(wblk, slab.astype(wblk.dtype),
                        preferred_element_type=f32)          # (tb*c_out, tm)
            o = jnp.maximum(o.reshape(tb, c_out, tm) + b, 0.0)
            if is_last:
                valid = min(tb, t_out - bi * tb)             # only real output rows
                pooled = pooled + jnp.sum(o[0:valid], axis=0)
            else:
                # ReLU output goes straight into the next layer's padded input
                dst[p_next + bi * tb:p_next + (bi + 1) * tb, 0:c_out, :] = o

        if not is_last:
            # Halo + tail zeroing AFTER the block writes: covers conv halos, the
            # junk rows t_out..nb*tb-1 and the strided-read extent.  Must be redone
            # every grid step because scratch persists across steps.
            rows_next = in_rows[li + 1]
            if p_next > 0:
                dst[0:p_next, 0:c_out, :] = jnp.zeros((p_next, c_out, tm), f32)
            if rows_next > p_next + t_out:
                dst[p_next + t_out:rows_next, 0:c_out, :] = jnp.zeros(
                    (rows_next - p_next - t_out, c_out, tm), f32)

    # -------- AdaptiveAvgPool1d(1) (already summed) + Flatten ----------------------
    z = pooled * (1.0 / conv_meta[-1][1])                    # (c_last, tm)

    # -------- encoder Linear + ReLU, then classifier MLP (relu on all but last) ----
    for i in range(n_fc):
        w = fc_w[i][...]
        z = jnp.dot(w, z.astype(w.dtype),
                    preferred_element_type=f32) + fc_b[i][...]
        if i < n_fc - 1:
            z = jnp.maximum(z, 0.0)

    out_ref[...] = z.astype(out_ref.dtype)                   # (num_classes, tm)


# ----------------------------------------------------------------------------
# Wrapper: layout glue, parameter packing, grid / BlockSpecs.
# ----------------------------------------------------------------------------
def blind_siglab_forward(x, params, *, mxu_dtype=jnp.bfloat16, tile_m=256, mxu_dim=128):
    """signals (B, N, T) -> logits (B, N, NUM_CLASSES) via a single fused Pallas call.

    mxu_dtype: MXU operand dtype.  bf16 is MXU-native on v5e/v6e/v7x and halves the
               weight / im2col footprint; accumulation is always f32.  Pass
               jnp.float32 for bit-accurate numerics.
    tile_m:    lanes (B*N elements) per grid step.  256 keeps the per-step working
               set inside v7x's 64 MiB VMEM at long T; raise on v5e/v6e.
    mxu_dim:   target MXU contraction depth / output rows per push.  128 is safe on
               every generation (v5e MXU is 128-deep); use 256 on v6e/v7x.
    """
    B, N, T = x.shape
    M = B * N
    conv_params, (w_enc, b_enc), cls_params = params

    # ---- static per-layer conv metadata + MXU time-blocking ----
    conv_meta = []
    t, c_in = T, IN_CHANNELS
    for lc in CONV_LAYERS:
        k, s, p = lc["kernel_size"], lc["stride"], lc["padding"]
        c_out = lc["out_channels"]
        t_out = _conv_out_len(t, k, s, p)
        # TB*K*C_in <= mxu_dim (contraction depth) and TB*C_out <= mxu_dim (rows)
        tb = max(1, min(t_out, mxu_dim // max(1, k * c_in), mxu_dim // max(1, c_out)))
        nb = pl.cdiv(t_out, tb)
        conv_meta.append((t, t_out, c_in, c_out, k, s, p, tb, nb))
        t, c_in = t_out, c_out
    conv_meta = tuple(conv_meta)
    n_conv = len(conv_meta)

    # padded-input rows per conv layer (layer 0 = the signal staging scratch):
    # must cover both the previous layer's block-write extent and this layer's
    # strided tap-read extent (no runtime OOB checks on VMEM refs!).
    in_rows = []
    for li, (t_in, t_out, ci, co, k, s, p, tb, nb) in enumerate(conv_meta):
        read_ext = (k - 1) + s * (tb * nb - 1) + 1
        if li == 0:
            rows = max(t_in + 2 * p, read_ext)
        else:
            prev = conv_meta[li - 1]
            rows = max(p + prev[7] * prev[8], read_ext)
        in_rows.append(rows)
    in_rows = tuple(in_rows)

    fc_list = [(w_enc, b_enc)] + list(cls_params)  # encoder fc + classifier linears
    n_fc = len(fc_list)
    num_classes = fc_list[-1][0].shape[0]

    # ---- lane tiling over M = B*N; keep the (parallel) grid >= 2 steps when
    #      there are enough lanes, so both v7x TensorCores get work ----
    lanes = _round_up(M, 128)
    tm = min(_round_up(tile_m, 128), lanes)
    if lanes >= 256 and lanes // tm < 2:
        tm = _round_up(pl.cdiv(lanes, 2), 128)
    tm = max(128, tm)
    m_pad = _round_up(M, tm)
    grid = (m_pad // tm,)

    # ---- input layout: (B,N,T) -> (M_pad, T_pad8); the time transpose happens
    #      inside the kernel (XLU), not as a separate wrapper-side HBM pass ----
    t_pad8 = _round_up(T, 8)
    use_bf16 = np.dtype(mxu_dtype) == np.dtype(jnp.bfloat16)
    in_dtype = jnp.bfloat16 if use_bf16 else x.dtype   # narrower input DMA in bf16 mode
    x2 = x.reshape(M, T).astype(in_dtype)
    x2 = jnp.pad(x2, ((0, m_pad - M), (0, t_pad8 - T)))

    kernel_inputs = [x2]
    # NOTE: once HBM-bound, pipeline_mode=pl.Buffered(3) on this spec can hide the
    # input DMA further; left at the default double-buffering here.
    in_specs = [pl.BlockSpec((tm, t_pad8), lambda m: (m, 0))]

    def add_resident(arr):
        # full-array block with a constant index_map -> stays VMEM-resident
        kernel_inputs.append(arr)
        in_specs.append(pl.BlockSpec(arr.shape, lambda m, _n=arr.ndim: (0,) * _n))

    # conv weights: block-diagonal kron(I_TB, W) so each time-block is ONE MXU dot
    for (w, b), (t_in, t_out, ci, co, k, s, p, tb, nb) in zip(conv_params, conv_meta):
        w2d = jnp.transpose(w, (0, 2, 1)).reshape(co, k * ci)     # (C_out, K*C_in)
        wblk = jnp.kron(jnp.eye(tb, dtype=w2d.dtype), w2d)        # (tb*C_out, tb*K*C_in)
        add_resident(wblk.astype(mxu_dtype))
        add_resident(b.reshape(co, 1).astype(jnp.float32))

    # encoder fc + classifier linears
    for (w, b) in fc_list:
        add_resident(w.astype(mxu_dtype))                          # (dout, din)
        add_resident(b.reshape(-1, 1).astype(jnp.float32))

    # ---- scratches: signal staging + ping-pong padded activations ----
    scratch_shapes = [pltpu.VMEM((in_rows[0], tm), jnp.float32)]
    n_act, max_rows, max_c = 0, 0, 0
    if n_conv >= 2:
        max_rows = max(in_rows[1:])
        max_c = max(m[2] for m in conv_meta[1:])
        n_act = 1 if n_conv == 2 else 2
        scratch_shapes += [pltpu.VMEM((max_rows, max_c, tm), jnp.float32)] * n_act

    # ---- explicit VMEM budget (re-derived for v7x's 64 MiB physical VMEM) ----
    est = 2 * tm * t_pad8 * np.dtype(in_dtype).itemsize            # x block, dbl-buffered
    est += 2 * num_classes * tm * 4                                # out block, dbl-buffered
    est += sum(int(a.size) * a.dtype.itemsize for a in kernel_inputs[1:])  # resident weights
    est += in_rows[0] * tm * 4                                     # signal staging scratch
    est += n_act * max_rows * max_c * tm * 4                       # activation scratches
    work = max(tb * (k * ci + co) for (_, _, ci, co, k, _, _, tb, _) in conv_meta)
    est += 2 * work * tm * 4                                       # per-block live tensors
    vmem_limit = int(min(64 * 2 ** 20, max(32 * 2 ** 20, 2 * est)))

    out = pl.pallas_call(
        functools.partial(_blind_siglab_kernel, conv_meta, in_rows, T, n_fc),
        out_shape=jax.ShapeDtypeStruct((num_classes, m_pad), jnp.float32),
        grid=grid,
        in_specs=in_specs,
        out_specs=pl.BlockSpec((num_classes, tm), lambda m: (0, m)),
        scratch_shapes=scratch_shapes,
        compiler_params=pltpu.CompilerParams(
            dimension_semantics=("parallel",),
            vmem_limit_bytes=vmem_limit),
    )(*kernel_inputs)

    # glue back: lane-dense (C, M_pad) -> (B, N, C)
    return out.T[:M].reshape(B, N, num_classes)


# ----------------------------------------------------------------------------
# Deterministic parameter init (shapes follow nn.Conv1d / nn.Linear in the module)
# ----------------------------------------------------------------------------
def init_params(key):
    n_keys = 2 * len(CONV_LAYERS) + 2 + 2 * (len(CLASSIFIER_HIDDEN) + 1)
    keys = jax.random.split(key, n_keys)
    ki = 0
    conv_params = []
    c_in = IN_CHANNELS
    for lc in CONV_LAYERS:
        c_out, k = lc["out_channels"], lc["kernel_size"]
        w = 0.3 * jax.random.normal(keys[ki], (c_out, c_in, k), jnp.float32); ki += 1
        b = 0.1 * jax.random.normal(keys[ki], (c_out,), jnp.float32); ki += 1
        conv_params.append((w, b))
        c_in = c_out
    w_enc = 0.3 * jax.random.normal(keys[ki], (FEATURE_DIM, c_in), jnp.float32); ki += 1
    b_enc = 0.1 * jax.random.normal(keys[ki], (FEATURE_DIM,), jnp.float32); ki += 1
    cls_params = []
    dims = (FEATURE_DIM,) + CLASSIFIER_HIDDEN + (NUM_CLASSES,)
    for din, dout in zip(dims[:-1], dims[1:]):
        w = 0.3 * jax.random.normal(keys[ki], (dout, din), jnp.float32); ki += 1
        b = 0.1 * jax.random.normal(keys[ki], (dout,), jnp.float32); ki += 1
        cls_params.append((w, b))
    return conv_params, (w_enc, b_enc), cls_params


# Pure-JAX reference (mirrors the PyTorch forward, NCW layout) for validation.
def reference_forward(x, params):
    hi = lax.Precision.HIGHEST
    conv_params, (w_enc, b_enc), cls_params = params
    B, N, T = x.shape
    h = x.reshape(B * N, 1, T)
    for (w, b), lc in zip(conv_params, CONV_LAYERS):
        h = lax.conv_general_dilated(
            h, w, window_strides=(lc["stride"],),
            padding=[(lc["padding"], lc["padding"])],
            dimension_numbers=("NCH", "OIH", "NCH"), precision=hi)
        h = jax.nn.relu(h + b[None, :, None])
    pooled = jnp.mean(h, axis=-1)                          # AdaptiveAvgPool1d(1) + Flatten
    z = jax.nn.relu(jnp.dot(pooled, w_enc.T, precision=hi) + b_enc)
    for i, (w, b) in enumerate(cls_params):
        z = jnp.dot(z, w.T, precision=hi) + b
        if i < len(cls_params) - 1:
            z = jax.nn.relu(z)
    return z.reshape(B, N, -1)


if __name__ == "__main__":
    key = jax.random.PRNGKey(0)
    kx, kp = jax.random.split(key)
    B, N, T = 2, 4, 16
    x = jax.random.normal(kx, (B, N, T), jnp.float32)
    params = init_params(kp)

    ref = reference_forward(x, params)
    scale = float(jnp.max(jnp.abs(ref))) + 1e-6

    # f32 MXU operands: tight check against the f32 reference
    out_f32 = jax.block_until_ready(
        blind_siglab_forward(x, params, mxu_dtype=jnp.float32))
    assert out_f32.shape == (B, N, NUM_CLASSES), out_f32.shape
    err = float(jnp.max(jnp.abs(out_f32 - ref)))
    assert err <= 2e-3 * scale + 1e-3, f"f32 max_err={err} (scale={scale})"

    # bf16 MXU operands (default; recommended on all generations). Accumulation and
    # all VPU math stay f32; tolerance tightened vs. the previous 0.1*scale check.
    out_bf = jax.block_until_ready(blind_siglab_forward(x, params))
    err_bf = float(jnp.max(jnp.abs(out_bf - ref)))
    assert err_bf <= 5e-2 * scale + 2e-2, f"bf16 max_err={err_bf} (scale={scale})"

    print("KERNEL_OK")
</pallas_src>

<mosaic_0001>
module attributes {stable_mosaic.version = 11 : i64} {
  func.func @_blind_siglab_kernel(%arg0: i32, %arg1: memref<128x16xf32, #tpu.memory_space<vmem>>, %arg2: memref<64x40xf32, #tpu.memory_space<vmem>>, %arg3: memref<8x1xf32, #tpu.memory_space<vmem>>, %arg4: memref<64x96xf32, #tpu.memory_space<vmem>>, %arg5: memref<16x1xf32, #tpu.memory_space<vmem>>, %arg6: memref<32x16xf32, #tpu.memory_space<vmem>>, %arg7: memref<32x1xf32, #tpu.memory_space<vmem>>, %arg8: memref<64x32xf32, #tpu.memory_space<vmem>>, %arg9: memref<64x1xf32, #tpu.memory_space<vmem>>, %arg10: memref<6x64xf32, #tpu.memory_space<vmem>>, %arg11: memref<6x1xf32, #tpu.memory_space<vmem>>, %arg12: memref<6x128xf32, #tpu.memory_space<vmem>>, %arg13: memref<20x128xf32, #tpu.memory_space<vmem>>, %arg14: memref<9x8x128xf32, #tpu.memory_space<vmem>>) attributes {dimension_semantics = [#tpu.dimension_semantics<parallel>], iteration_bounds = array<i64: 1>, scalar_prefetch = 0 : i64, scratch_operands = 2 : i64, tpu.core_type = #tpu.core_type<tc>, window_params = [{transform_indices = @transform_0, window_bounds = array<i64: 128, 16>}, {pipeline_mode = #tpu.pipeline_mode<synchronous>, transform_indices = @transform_1, window_bounds = array<i64: 64, 40>}, {pipeline_mode = #tpu.pipeline_mode<synchronous>, transform_indices = @transform_2, window_bounds = array<i64: 8, 1>}, {pipeline_mode = #tpu.pipeline_mode<synchronous>, transform_indices = @transform_3, window_bounds = array<i64: 64, 96>}, {pipeline_mode = #tpu.pipeline_mode<synchronous>, transform_indices = @transform_4, window_bounds = array<i64: 16, 1>}, {pipeline_mode = #tpu.pipeline_mode<synchronous>, transform_indices = @transform_5, window_bounds = array<i64: 32, 16>}, {pipeline_mode = #tpu.pipeline_mode<synchronous>, transform_indices = @transform_6, window_bounds = array<i64: 32, 1>}, {pipeline_mode = #tpu.pipeline_mode<synchronous>, transform_indices = @transform_7, window_bounds = array<i64: 64, 32>}, {pipeline_mode = #tpu.pipeline_mode<synchronous>, transform_indices = @transform_8, window_bounds = array<i64: 64, 1>}, {pipeline_mode = #tpu.pipeline_mode<synchronous>, transform_indices = @transform_9, window_bounds = array<i64: 6, 64>}, {pipeline_mode = #tpu.pipeline_mode<synchronous>, transform_indices = @transform_10, window_bounds = array<i64: 6, 1>}, {transform_indices = @transform_11, window_bounds = array<i64: 6, 128>}]} {
    %c0 = arith.constant 0 : index
    %c0_0 = arith.constant 0 : index
    %0 = vector.load %arg1[%c0, %c0_0] : memref<128x16xf32, #tpu.memory_space<vmem>>, vector<128x16xf32>
    %1 = tpu.transpose %0, [1, 0] : vector<128x16xf32> -> vector<16x128xf32>
    %cst = arith.constant 0.000000e+00 : f32
    %2 = vector.broadcast %cst : f32 to vector<2x128xf32>
    %c0_1 = arith.constant 0 : index
    %c0_2 = arith.constant 0 : index
    %3 = vector.load %arg13[%c0_1, %c0_2] : memref<20x128xf32, #tpu.memory_space<vmem>>, vector<2x128xf32>
    tpu.vector_store %arg13[%c0_1, %c0_2], %2 {strides = array<i32>} : memref<20x128xf32, #tpu.memory_space<vmem>>, vector<2x128xf32>,
    %c2 = arith.constant 2 : index
    %c0_3 = arith.constant 0 : index
    %4 = vector.load %arg13[%c2, %c0_3] : memref<20x128xf32, #tpu.memory_space<vmem>>, vector<16x128xf32>
    tpu.vector_store %arg13[%c2, %c0_3], %1 {strides = array<i32>} : memref<20x128xf32, #tpu.memory_space<vmem>>, vector<16x128xf32>,
    %cst_4 = arith.constant 0.000000e+00 : f32
    %5 = vector.broadcast %cst_4 : f32 to vector<2x128xf32>
    %c18 = arith.constant 18 : index
    %c0_5 = arith.constant 0 : index
    %6 = vector.load %arg13[%c18, %c0_5] : memref<20x128xf32, #tpu.memory_space<vmem>>, vector<2x128xf32>
    tpu.vector_store %arg13[%c18, %c0_5], %5 {strides = array<i32>} : memref<20x128xf32, #tpu.memory_space<vmem>>, vector<2x128xf32>,
    %c0_6 = arith.constant 0 : index
    %c0_7 = arith.constant 0 : index
    %7 = vector.load %arg2[%c0_6, %c0_7] : memref<64x40xf32, #tpu.memory_space<vmem>>, vector<64x40xf32>
    %c0_8 = arith.constant 0 : index
    %c0_9 = arith.constant 0 : index
    %8 = vector.load %arg3[%c0_8, %c0_9] : memref<8x1xf32, #tpu.memory_space<vmem>>, vector<8x1xf32>
    %9 = vector.shape_cast %8 : vector<8x1xf32> to vector<1x8x1xf32>
    %c0_10 = arith.constant 0 : index
    %c0_11 = arith.constant 0 : index
    %10 = tpu.strided_load %arg13[%c0_10, %c0_11] {strides = array<i32: 2, 1>} : memref<20x128xf32, #tpu.memory_space<vmem>>, vector<8x128xf32>
    %11 = vector.shape_cast %10 : vector<8x128xf32> to vector<8x1x128xf32>
    %c1 = arith.constant 1 : index
    %c0_12 = arith.constant 0 : index
    %12 = tpu.strided_load %arg13[%c1, %c0_12] {strides = array<i32: 2, 1>} : memref<20x128xf32, #tpu.memory_space<vmem>>, vector<8x128xf32>
    %13 = vector.shape_cast %12 : vector<8x128xf32> to vector<8x1x128xf32>
    %c2_13 = arith.constant 2 : index
    %c0_14 = arith.constant 0 : index
    %14 = tpu.strided_load %arg13[%c2_13, %c0_14] {strides = array<i32: 2, 1>} : memref<20x128xf32, #tpu.memory_space<vmem>>, vector<8x128xf32>
    %15 = vector.shape_cast %14 : vector<8x128xf32> to vector<8x1x128xf32>
    %c3 = arith.constant 3 : index
    %c0_15 = arith.constant 0 : index
    %16 = tpu.strided_load %arg13[%c3, %c0_15] {strides = array<i32: 2, 1>} : memref<20x128xf32, #tpu.memory_space<vmem>>, vector<8x128xf32>
    %17 = vector.shape_cast %16 : vector<8x128xf32> to vector<8x1x128xf32>
    %c4 = arith.constant 4 : index
    %c0_16 = arith.constant 0 : index
    %18 = tpu.strided_load %arg13[%c4, %c0_16] {strides = array<i32: 2, 1>} : memref<20x128xf32, #tpu.memory_space<vmem>>, vector<8x128xf32>
    %19 = vector.shape_cast %18 : vector<8x128xf32> to vector<8x1x128xf32>
    %20 = tpu.concatenate %11, %13, %15, %17, %19 in 1 : vector<8x1x128xf32>, vector<8x1x128xf32>, vector<8x1x128xf32>, vector<8x1x128xf32>, vector<8x1x128xf32> -> vector<8x5x128xf32>
    %21 = vector.shape_cast %20 : vector<8x5x128xf32> to vector<40x128xf32>
    %cst_17 = arith.constant dense<0.000000e+00> : vector<64x128xf32>
    %22 = tpu.matmul %7, %21, %cst_17 {dimension_numbers = #tpu.dot_dimension_numbers<[1], [0], [0], [1], [0, 0, 1, 1], [], []>} : vector<64x40xf32>, vector<40x128xf32>, vector<64x128xf32> -> vector<64x128xf32>
    %23 = vector.shape_cast %22 : vector<64x128xf32> to vector<8x8x128xf32>
    %24 = vector.broadcast %9 : vector<1x8x1xf32> to vector<8x8x128xf32>
    %25 = arith.addf %23, %24 : vector<8x8x128xf32>
    %cst_18 = arith.constant 0.000000e+00 : f32
    %26 = vector.broadcast %cst_18 : f32 to vector<8x8x128xf32>
    %27 = arith.maximumf %25, %26 : vector<8x8x128xf32>
    %c1_19 = arith.constant 1 : index
    %c0_20 = arith.constant 0 : index
    %c0_21 = arith.constant 0 : index
    %28 = vector.load %arg14[%c1_19, %c0_20, %c0_21] : memref<9x8x128xf32, #tpu.memory_space<vmem>>, vector<8x8x128xf32>
    tpu.vector_store %arg14[%c1_19, %c0_20, %c0_21], %27 {strides = array<i32>} : memref<9x8x128xf32, #tpu.memory_space<vmem>>, vector<8x8x128xf32>,
    %cst_22 = arith.constant 0.000000e+00 : f32
    %29 = vector.broadcast %cst_22 : f32 to vector<1x8x128xf32>
    %c0_23 = arith.constant 0 : index
    %c0_24 = arith.constant 0 : index
    %c0_25 = arith.constant 0 : index
    %30 = vector.load %arg14[%c0_23, %c0_24, %c0_25] : memref<9x8x128xf32, #tpu.memory_space<vmem>>, vector<1x8x128xf32>
    tpu.vector_store %arg14[%c0_23, %c0_24, %c0_25], %29 {strides = array<i32>} : memref<9x8x128xf32, #tpu.memory_space<vmem>>, vector<1x8x128xf32>,
    %c0_26 = arith.constant 0 : index
    %c0_27 = arith.constant 0 : index
    %31 = vector.load %arg4[%c0_26, %c0_27] : memref<64x96xf32, #tpu.memory_space<vmem>>, vector<64x96xf32>
    %c0_28 = arith.constant 0 : index
    %c0_29 = arith.constant 0 : index
    %32 = vector.load %arg5[%c0_28, %c0_29] : memref<16x1xf32, #tpu.memory_space<vmem>>, vector<16x1xf32>
    %33 = vector.shape_cast %32 : vector<16x1xf32> to vector<1x16x1xf32>
    %cst_30 = arith.constant 0.000000e+00 : f32
    %34 = vector.broadcast %cst_30 : f32 to vector<16x128xf32>
    %c0_31 = arith.constant 0 : index
    %c0_32 = arith.constant 0 : index
    %c0_33 = arith.constant 0 : index
    %35 = tpu.strided_load %arg14[%c0_31, %c0_32, %c0_33] {strides = array<i32: 2, 1, 1>} : memref<9x8x128xf32, #tpu.memory_space<vmem>>, vector<4x8x128xf32>
    %c1_34 = arith.constant 1 : index
    %c0_35 = arith.constant 0 : index
    %c0_36 = arith.constant 0 : index
    %36 = tpu.strided_load %arg14[%c1_34, %c0_35, %c0_36] {strides = array<i32: 2, 1, 1>} : memref<9x8x128xf32, #tpu.memory_space<vmem>>, vector<4x8x128xf32>
    %c2_37 = arith.constant 2 : index
    %c0_38 = arith.constant 0 : index
    %c0_39 = arith.constant 0 : index
    %37 = tpu.strided_load %arg14[%c2_37, %c0_38, %c0_39] {strides = array<i32: 2, 1, 1>} : memref<9x8x128xf32, #tpu.memory_space<vmem>>, vector<4x8x128xf32>
    %38 = tpu.concatenate %35, %36, %37 in 1 : vector<4x8x128xf32>, vector<4x8x128xf32>, vector<4x8x128xf32> -> vector<4x24x128xf32>
    %39 = vector.shape_cast %38 : vector<4x24x128xf32> to vector<96x128xf32>
    %cst_40 = arith.constant dense<0.000000e+00> : vector<64x128xf32>
    %40 = tpu.matmul %31, %39, %cst_40 {dimension_numbers = #tpu.dot_dimension_numbers<[1], [0], [0], [1], [0, 0, 1, 1], [], []>} : vector<64x96xf32>, vector<96x128xf32>, vector<64x128xf32> -> vector<64x128xf32>
    %41 = vector.shape_cast %40 : vector<64x128xf32> to vector<4x16x128xf32>
    %42 = vector.broadcast %33 : vector<1x16x1xf32> to vector<4x16x128xf32>
    %43 = arith.addf %41, %42 : vector<4x16x128xf32>
    %cst_41 = arith.constant 0.000000e+00 : f32
    %44 = vector.broadcast %cst_41 : f32 to vector<4x16x128xf32>
    %45 = arith.maximumf %43, %44 : vector<4x16x128xf32>
    %cst_42 = arith.constant dense<0.000000e+00> : vector<16x128xf32>
    %46 = vector.multi_reduction <add>, %45, %cst_42 [0] : vector<4x16x128xf32> to vector<16x128xf32>
    %47 = arith.addf %34, %46 : vector<16x128xf32>
    %cst_43 = arith.constant 2.500000e-01 : f32
    %48 = vector.broadcast %cst_43 : f32 to vector<16x128xf32>
    %49 = arith.mulf %47, %48 : vector<16x128xf32>
    %c0_44 = arith.constant 0 : index
    %c0_45 = arith.constant 0 : index
    %50 = vector.load %arg6[%c0_44, %c0_45] : memref<32x16xf32, #tpu.memory_space<vmem>>, vector<32x16xf32>
    %cst_46 = arith.constant dense<0.000000e+00> : vector<32x128xf32>
    %51 = tpu.matmul %50, %49, %cst_46 {dimension_numbers = #tpu.dot_dimension_numbers<[1], [0], [0], [1], [0, 0, 1, 1], [], []>} : vector<32x16xf32>, vector<16x128xf32>, vector<32x128xf32> -> vector<32x128xf32>
    %c0_47 = arith.constant 0 : index
    %c0_48 = arith.constant 0 : index
    %52 = vector.load %arg7[%c0_47, %c0_48] : memref<32x1xf32, #tpu.memory_space<vmem>>, vector<32x1xf32>
    %53 = vector.broadcast %52 : vector<32x1xf32> to vector<32x128xf32>
    %54 = arith.addf %51, %53 : vector<32x128xf32>
    %cst_49 = arith.constant 0.000000e+00 : f32
    %55 = vector.broadcast %cst_49 : f32 to vector<32x128xf32>
    %56 = arith.maximumf %54, %55 : vector<32x128xf32>
    %c0_50 = arith.constant 0 : index
    %c0_51 = arith.constant 0 : index
    %57 = vector.load %arg8[%c0_50, %c0_51] : memref<64x32xf32, #tpu.memory_space<vmem>>, vector<64x32xf32>
    %cst_52 = arith.constant dense<0.000000e+00> : vector<64x128xf32>
    %58 = tpu.matmul %57, %56, %cst_52 {dimension_numbers = #tpu.dot_dimension_numbers<[1], [0], [0], [1], [0, 0, 1, 1], [], []>} : vector<64x32xf32>, vector<32x128xf32>, vector<64x128xf32> -> vector<64x128xf32>
    %c0_53 = arith.constant 0 : index
    %c0_54 = arith.constant 0 : index
    %59 = vector.load %arg9[%c0_53, %c0_54] : memref<64x1xf32, #tpu.memory_space<vmem>>, vector<64x1xf32>
    %60 = vector.broadcast %59 : vector<64x1xf32> to vector<64x128xf32>
    %61 = arith.addf %58, %60 : vector<64x128xf32>
    %cst_55 = arith.constant 0.000000e+00 : f32
    %62 = vector.broadcast %cst_55 : f32 to vector<64x128xf32>
    %63 = arith.maximumf %61, %62 : vector<64x128xf32>
    %c0_56 = arith.constant 0 : index
    %c0_57 = arith.constant 0 : index
    %64 = vector.load %arg10[%c0_56, %c0_57] : memref<6x64xf32, #tpu.memory_space<vmem>>, vector<6x64xf32>
    %cst_58 = arith.constant dense<0.000000e+00> : vector<6x128xf32>
    %65 = tpu.matmul %64, %63, %cst_58 {dimension_numbers = #tpu.dot_dimension_numbers<[1], [0], [0], [1], [0, 0, 1, 1], [], []>} : vector<6x64xf32>, vector<64x128xf32>, vector<6x128xf32> -> vector<6x128xf32>
    %c0_59 = arith.constant 0 : index
    %c0_60 = arith.constant 0 : index
    %66 = vector.load %arg11[%c0_59, %c0_60] : memref<6x1xf32, #tpu.memory_space<vmem>>, vector<6x1xf32>
    %67 = vector.broadcast %66 : vector<6x1xf32> to vector<6x128xf32>
    %68 = arith.addf %65, %67 : vector<6x128xf32>
    %c0_61 = arith.constant 0 : index
    %c0_62 = arith.constant 0 : index
    %69 = vector.load %arg12[%c0_61, %c0_62] : memref<6x128xf32, #tpu.memory_space<vmem>>, vector<6x128xf32>
    tpu.vector_store %arg12[%c0_61, %c0_62], %68 {strides = array<i32>} : memref<6x128xf32, #tpu.memory_space<vmem>>, vector<6x128xf32>,
    return
  }
  func.func @transform_0(%arg0: i32) -> (i32, i32) {
    %c0_i32 = arith.constant 0 : i32
    %c0_i32_0 = arith.constant 0 : i32
    return %arg0, %c0_i32 : i32, i32
  }
  func.func @transform_1(%arg0: i32) -> (i32, i32) {
    %c0_i32 = arith.constant 0 : i32
    %c0_i32_0 = arith.constant 0 : i32
    %c0_i32_1 = arith.constant 0 : i32
    return %c0_i32, %c0_i32_0 : i32, i32
  }
  func.func @transform_2(%arg0: i32) -> (i32, i32) {
    %c0_i32 = arith.constant 0 : i32
    %c0_i32_0 = arith.constant 0 : i32
    %c0_i32_1 = arith.constant 0 : i32
    return %c0_i32, %c0_i32_0 : i32, i32
  }
  func.func @transform_3(%arg0: i32) -> (i32, i32) {
    %c0_i32 = arith.constant 0 : i32
    %c0_i32_0 = arith.constant 0 : i32
    %c0_i32_1 = arith.constant 0 : i32
    return %c0_i32, %c0_i32_0 : i32, i32
  }
  func.func @transform_4(%arg0: i32) -> (i32, i32) {
    %c0_i32 = arith.constant 0 : i32
    %c0_i32_0 = arith.constant 0 : i32
    %c0_i32_1 = arith.constant 0 : i32
    return %c0_i32, %c0_i32_0 : i32, i32
  }
  func.func @transform_5(%arg0: i32) -> (i32, i32) {
    %c0_i32 = arith.constant 0 : i32
    %c0_i32_0 = arith.constant 0 : i32
    %c0_i32_1 = arith.constant 0 : i32
    return %c0_i32, %c0_i32_0 : i32, i32
  }
  func.func @transform_6(%arg0: i32) -> (i32, i32) {
    %c0_i32 = arith.constant 0 : i32
    %c0_i32_0 = arith.constant 0 : i32
    %c0_i32_1 = arith.constant 0 : i32
    return %c0_i32, %c0_i32_0 : i32, i32
  }
  func.func @transform_7(%arg0: i32) -> (i32, i32) {
    %c0_i32 = arith.constant 0 : i32
    %c0_i32_0 = arith.constant 0 : i32
    %c0_i32_1 = arith.constant 0 : i32
    return %c0_i32, %c0_i32_0 : i32, i32
  }
  func.func @transform_8(%arg0: i32) -> (i32, i32) {
    %c0_i32 = arith.constant 0 : i32
    %c0_i32_0 = arith.constant 0 : i32
    %c0_i32_1 = arith.constant 0 : i32
    return %c0_i32, %c0_i32_0 : i32, i32
  }
  func.func @transform_9(%arg0: i32) -> (i32, i32) {
    %c0_i32 = arith.constant 0 : i32
    %c0_i32_0 = arith.constant 0 : i32
    %c0_i32_1 = arith.constant 0 : i32
    return %c0_i32, %c0_i32_0 : i32, i32
  }
  func.func @transform_10(%arg0: i32) -> (i32, i32) {
    %c0_i32 = arith.constant 0 : i32
    %c0_i32_0 = arith.constant 0 : i32
    %c0_i32_1 = arith.constant 0 : i32
    return %c0_i32, %c0_i32_0 : i32, i32
  }
  func.func @transform_11(%arg0: i32) -> (i32, i32) {
    %c0_i32 = arith.constant 0 : i32
    %c0_i32_0 = arith.constant 0 : i32
    return %c0_i32, %arg0 : i32, i32
  }
}

</mosaic_0001>

<bundles_post_ra>
// kernel: tpu_custom_call.1
= control target key start
LH: loop header
LB: loop body
LE: loop exit
PB: predicated region body
PF: predicated region fallthrough
CT: control target
= control target key end

     0   :  { %v2191_v2 = vmov 0.0   ;;  %s2741_s0 = inlined_call_operand.vmem [shape: f32[128,16], index: 0, kind: input, shape index: {}]   ;;  %s2742_s1 = inlined_call_operand.vmem [shape: f32[64,40], index: 1, kind: input, shape index: {}]   ;;  %s2743_s2 = inlined_call_operand.vmem [shape: f32[8,1], index: 2, kind: input, shape index: {}]   ;;  %s2744_s3 = inlined_call_operand.vmem [shape: f32[64,96], index: 3, kind: input, shape index: {}]   ;;  %s2745_s4 = inlined_call_operand.vmem [shape: f32[16,1], index: 4, kind: input, shape index: {}]   ;;  %s2746_s5 = inlined_call_operand.vmem [shape: f32[32,16], index: 5, kind: input, shape index: {}]   ;;  %s2747_s6 = inlined_call_operand.vmem [shape: f32[32,1], index: 6, kind: input, shape index: {}]   ;;  %s2748_s7 = inlined_call_operand.vmem [shape: f32[64,32], index: 7, kind: input, shape index: {}]   ;;  %s2749_s8 = inlined_call_operand.vmem [shape: f32[64,1], index: 8, kind: input, shape index: {}]   ;;  %s2750_s9 = inlined_call_operand.vmem [shape: f32[6,64], index: 9, kind: input, shape index: {}]   ;;  %s2751_s10 = inlined_call_operand.vmem [shape: f32[6,1], index: 10, kind: input, shape index: {}]   ;;  %s2752_s11 = inlined_call_operand.hbm [shape: f32[6,128], index: 11, kind: output, shape index: {}]  }
   0x1   :  { %v39_v0 = vld [vmem:[%s2741_s0] sm:$0xff]  ;;  %v40_v1 = vld [vmem:[%s2741_s0 + $0x8] sm:$0xff]  ;;  %87 = vst [vmem:[#allocation2] sm:$0x3] %v2191_v2  ;;  %90 = vst [vmem:[#allocation2 + $0x12] sm:$0x3] %v2191_v2 }
   0x2   :  { %55 = vxpose.xlu0.b32.start [1/16] (narrow) %v39_v0, 16 }
   0x6   :  { %56 = vxpose.xlu0.b32.cont [2/16] (narrow) %v40_v1, 16 }
   0x7   :  { %16 = vsyncpa [#allocation5], 0  ;;  %v41_v3 = vld [vmem:[%s2741_s0 + $0x10] sm:$0xff]  ;;  %v42_v4 = vld [vmem:[%s2741_s0 + $0x18] sm:$0xff]  ;;  %vm1133_vm0 = vcmask 326656   ;;  %v2192_v19 = vmov 0   ;;  %v106_v28 = vlaneseq }
   0x8   :  { %v43_v5 = vld [vmem:[%s2741_s0 + $0x20] sm:$0xff]  ;;  %v44_v6 = vld [vmem:[%s2741_s0 + $0x28] sm:$0xff]  ;;  %v45_v7 = vld [vmem:[%s2741_s0 + $0x30] sm:$0xff]  ;;  %2165 = vset.pattern.permute.xlu1 %v2192_v19  ;;  %v2193_v26 = vmov 1966171168   ;;  %vm527_vm1 = vcmask 1040384  }
   0x9   :  { %v46_v8 = vld [vmem:[%s2741_s0 + $0x38] sm:$0xff]  ;;  %v47_v9 = vld [vmem:[%s2741_s0 + $0x40] sm:$0xff]  ;;  %v48_v10 = vld [vmem:[%s2741_s0 + $0x48] sm:$0xff]  ;;  %v104_v27 = vunpack.c.l.s4 %v2193_v26  ;;  %v107_v32 = vshrl.u32 %v106_v28, 7  ;;  %vm536_vm2 = vcmask 1041408   ;;  %vm545_vm3 = vcmask 1042432  }
   0xa   :  { %57 = vxpose.xlu0.b32.cont [3/16] (narrow) %v41_v3, 16  ;;  %v49_v11 = vld [vmem:[%s2741_s0 + $0x50] sm:$0xff]  ;;  %v50_v12 = vld [vmem:[%s2741_s0 + $0x58] sm:$0xff]  ;;  %v51_v13 = vld [vmem:[%s2741_s0 + $0x60] sm:$0xff]  ;;  %vm554_vm4 = vcmask 1043456   ;;  %vm1317_vm5 = vcmask 785408  }
   0xb   :  { %v52_v14 = vld [vmem:[%s2741_s0 + $0x68] sm:$0xff]  ;;  %v53_v15 = vld [vmem:[%s2741_s0 + $0x70] sm:$0xff]  ;;  %v54_v16 = vld [vmem:[%s2741_s0 + $0x78] sm:$0xff]  ;;  %v105_v31 = vunpack.c.0.s8 %v104_v27  ;;  %v2340_v36 = vsub.s32 0, %v107_v32  ;;  %vm1511_vm6 = vcmask 130048   ;;  %vm1669_vm7 = vcmask 261120  }
   0xc   :  { %v91_v17 = vld [vmem:[%s2742_s1] sm:$0xff]  ;;  %v1303_v21 = vld [vmem:[%s2745_s4 + $0x8] sm:$0xff]  ;;  %v1489_v24 = vld [vmem:[%s2747_s6 + $0x10] sm:$0xff]  ;;  %vm2195_vm8 = vmmov 0   ;;  %vm1814_vm9 = vcmask 523264  }
   0xd   :  { %2006 = vmatprep.mubr.msk.f32.mxu0 %vm1133_vm0, %v91_v17  ;;  %v99_v18 = vld [vmem:[%s2743_s2] sm:$0xff]  ;;  %v1488_v23 = vld [vmem:[%s2747_s6 + $0x8] sm:$0xff]  ;;  %v1490_v29 = vld [vmem:[%s2747_s6 + $0x18] sm:$0xff]  ;;  %v2335_v34 = vsub.s32 %v105_v31, %v107_v32  ;;  %s2196_s2 = smov [#allocation4]  }
   0xe   :  { %58 = vxpose.xlu0.b32.cont [4/16] (narrow) %v42_v4, 16  ;;  %1265 = vperm.xlu1 %2165, %v99_v18   ;;  %v1302_v20 = vld [vmem:[%s2745_s4] sm:$0xff]  ;;  %v1622_v35 = vld [vmem:[%s2749_s8 + $0x8] sm:$0xff]  ;;  %v1623_v45 = vld [vmem:[%s2749_s8 + $0x10] sm:$0xff]  ;;  %s1895_s20 = sshll.u32 %s2196_s2, 4  ;;  %s1896_s20 = int_to_ptr.vmem [resolvable:$true] %s1895_s20 }
   0xf   :  { %v1487_v22 = vld [vmem:[%s2747_s6] sm:$0xff]  ;;  %v1624_v63 = vld [vmem:[%s2749_s8 + $0x18] sm:$0xff]  ;;  %s2167_s21 = scalar_lea.vmem %s1896_s20, 128  ;;  %p2172_p1 = scmp.lt.s32.totalorder %s1896_s20, %s1896_s20 }
  0x10   :  { %v1621_v33 = vld [vmem:[%s2749_s8] sm:$0xff]  ;;  %p2168_p0 = scmp.ne.s32.totalorder %s1896_s20, %s2167_s21  ;;  %p2173_p2 = scmp.lt.s32.totalorder %s2167_s21, %s2167_s21 }
  0x11   :  { %v1625_v17 = vld [vmem:[%s2749_s8 + $0x20] sm:$0xff] }
  0x12   :  { %59 = vxpose.xlu0.b32.cont [5/16] (narrow) %v43_v5, 16  ;;  %1449 = vperm.xlu1 %2165, %v1302_v20   ;;  %p2174_p3 = por %p2173_p2, %p2172_p1 }
  0x14   :  { %p2175_p4 = pnand %p2174_p3, %p2168_p0 }
  0x16   :  { %60 = vxpose.xlu0.b32.cont [6/16] (narrow) %v44_v6, 16  ;;  %1454 = vperm.xlu1 %2165, %v1303_v21  }
  0x1a   :  { %61 = vxpose.xlu0.b32.cont [7/16] (narrow) %v45_v7, 16  ;;  %1493 = vperm.xlu1 %2165, %v1487_v22  }
  0x1e   :  { %62 = vxpose.xlu0.b32.cont [8/16] (narrow) %v46_v8, 16  ;;  %1498 = vperm.xlu1 %2165, %v1488_v23  }
  0x22   :  { %63 = vxpose.xlu0.b32.cont [9/16] (narrow) %v47_v9, 16  ;;  %1503 = vperm.xlu1 %2165, %v1489_v24  }
  0x26   :  { %64 = vxpose.xlu0.b32.cont [10/16] (narrow) %v48_v10, 16  ;;  %1508 = vperm.xlu1 %2165, %v1490_v29  }
  0x2a   :  { %65 = vxpose.xlu0.b32.cont [11/16] (narrow) %v49_v11, 16  ;;  %1631 = vperm.xlu1 %2165, %v1621_v33  }
  0x2e   :  { %66 = vxpose.xlu0.b32.cont [12/16] (narrow) %v50_v12, 16  ;;  %1636 = vperm.xlu1 %2165, %v1622_v35   ;;  %v1626_v35 = vld [vmem:[%s2749_s8 + $0x28] sm:$0xff] }
  0x32   :  { %67 = vxpose.xlu0.b32.cont [13/16] (narrow) %v51_v13, 16  ;;  %1641 = vperm.xlu1 %2165, %v1623_v45  }
  0x36   :  { %68 = vxpose.xlu0.b32.cont [14/16] (narrow) %v52_v14, 16  ;;  %1646 = vperm.xlu1 %2165, %v1624_v63  }
  0x3a   :  { %69 = vxpose.xlu0.b32.cont [15/16] (narrow) %v53_v15, 16  ;;  %1651 = vperm.xlu1 %2165, %v1625_v17   ;;  %v1628_v17 = vld [vmem:[%s2749_s8 + $0x38] sm:$0xff] }
  0x3e   :  { %70 = vxpose.xlu0.b32.end [16/16] (narrow) %v54_v16, 16  ;;  %1656 = vperm.xlu1 %2165, %v1626_v35   ;;  %v1808_v35 = vld [vmem:[%s2751_s10] sm:$0x3f] }
  0x67   :  { %2166 = vset.pattern.permute.xlu0 %v2192_v19 }
  0x82   :  { %v71_v25 = vpop.trf.xlu0 }
  0x83   :  { %88 = vst [vmem:[#allocation2 + $0x2] sm:$0xff] %v71_v25 }
  0x86   :  { %v72_v30 = vpop.trf.xlu0 }
  0x87   :  { %89 = vst [vmem:[#allocation2 + $0xa] sm:$0xff] %v72_v30 }
  0x8e   :  { %v2342_v37 = vld [vmem:[#allocation2 + $0x1] ss:$2 sm:$0xff]  ;;  %v2344_v38 = vld [vmem:[#allocation2] ss:$2 sm:$0xff] }
  0x8f   :  { %v2346_v39 = vld [vmem:[#allocation2 + $0x2] ss:$2 sm:$0xff]  ;;  %v162_v40 = vcombine.high %v2342_v37, %v2342_v37  ;;  %v102_v41 = vcombine.high %v2344_v38, %v2344_v38  ;;  %v109_v42 = vrot.slane %v2344_v38, %v2335_v34  ;;  %v169_v43 = vrot.slane %v2342_v37, %v2335_v34  ;;  %v2356_v44 = vld [vmem:[#allocation2 + $0x3] ss:$2 sm:$0xff] }
  0x90   :  { %v214_v46 = vcombine.high %v2346_v39, %v2346_v39  ;;  %v221_v47 = vrot.slane %v2346_v39, %v2335_v34  ;;  %v266_v48 = vcombine.high %v2356_v44, %v2356_v44  ;;  %v273_v49 = vrot.slane %v2356_v44, %v2335_v34  ;;  %v2373_v58 = vld [vmem:[#allocation2 + $0x4] ss:$2 sm:$0xff] }
  0x91   :  { %v117_v50 = vcombine.high %v109_v42, %v109_v42  ;;  %v125_v51 = vrot.slane %v109_v42, %v2335_v34  ;;  %v177_v52 = vcombine.high %v169_v43, %v169_v43  ;;  %v185_v53 = vrot.slane %v169_v43, %v2335_v34 }
  0x92   :  { %v229_v54 = vcombine.high %v221_v47, %v221_v47  ;;  %v237_v55 = vrot.slane %v221_v47, %v2335_v34  ;;  %v281_v56 = vcombine.high %v273_v49, %v273_v49  ;;  %v289_v57 = vrot.slane %v273_v49, %v2335_v34 }
  0x93   :  { %v139_v59 = vrot.slane %v117_v50, %v2335_v34  ;;  %v147_v60 = vcombine.high %v125_v51, %v125_v51  ;;  %v199_v61 = vrot.slane %v177_v52, %v2335_v34  ;;  %v207_v62 = vcombine.high %v185_v53, %v185_v53 }
  0x94   :  { %v251_v0 = vrot.slane %v229_v54, %v2335_v34  ;;  %v259_v1 = vcombine.high %v237_v55, %v237_v55  ;;  %v303_v3 = vrot.slane %v281_v56, %v2335_v34  ;;  %v311_v4 = vcombine.high %v289_v57, %v289_v57 }
  0x95   :  { %v149_v5 = vcombine.high %v139_v59, %v139_v59  ;;  %v209_v6 = vcombine.high %v199_v61, %v199_v61  ;;  %v318_v7 = vcombine.high %v2373_v58, %v2373_v58  ;;  %v325_v8 = vrot.slane %v2373_v58, %v2335_v34 }
  0x96   :  { %v261_v9 = vcombine.high %v251_v0, %v251_v0  ;;  %v313_v10 = vcombine.high %v303_v3, %v303_v3  ;;  %v370_v11 = vrot.slane %v185_v53, %v2340_v36  ;;  %v374_v12 = vrot.slane %v199_v61, %v2340_v36 }
  0x97   :  { %v333_v13 = vcombine.high %v325_v8, %v325_v8  ;;  %v341_v14 = vrot.slane %v325_v8, %v2335_v34  ;;  %v378_v15 = vrot.slane %v207_v62, %v2340_v36  ;;  %v382_v16 = vrot.slane %v209_v6, %v2340_v36  ;;  %v1627_v62 = vld [vmem:[%s2749_s8 + $0x30] sm:$0xff] }
  0x98   :  { %v410_v18 = vrot.slane %v237_v55, %v2340_v36  ;;  %v414_v19 = vrot.slane %v251_v0, %v2340_v36  ;;  %v418_v20 = vrot.slane %v259_v1, %v2340_v36  ;;  %v422_v21 = vrot.slane %v261_v9, %v2340_v36  ;;  %1661 = vperm.xlu1 %2165, %v1627_v62  }
  0x99   :  { %v355_v22 = vrot.slane %v333_v13, %v2335_v34  ;;  %v363_v23 = vcombine.high %v341_v14, %v341_v14  ;;  %v450_v24 = vrot.slane %v289_v57, %v2340_v36  ;;  %v454_v25 = vrot.slane %v303_v3, %v2340_v36 }
  0x9a   :  { %v458_v26 = vrot.slane %v311_v4, %v2340_v36  ;;  %v462_v27 = vrot.slane %v313_v10, %v2340_v36  ;;  %v490_v28 = vrot.slane %v341_v14, %v2340_v36  ;;  %v528_v29 = vsel %vm527_vm1, %v125_v51, %v370_v11 }
  0x9b   :  { %v365_v30 = vcombine.high %v355_v22, %v355_v22  ;;  %v494_v31 = vrot.slane %v355_v22, %v2340_v36  ;;  %v498_v32 = vrot.slane %v363_v23, %v2340_v36  ;;  %v529_v33 = vsel %vm527_vm1, %v139_v59, %v374_v12 }
  0x9c   :  { %v530_v42 = vsel %vm527_vm1, %v147_v60, %v378_v15  ;;  %v531_v43 = vsel %vm527_vm1, %v149_v5, %v382_v16  ;;  %v537_v45 = vsel %vm536_vm2, %v528_v29, %v410_v18  ;;  %v538_v47 = vsel %vm536_vm2, %v529_v33, %v414_v19  ;;  %1666 = vperm.xlu1 %2165, %v1628_v17  }
  0x9d   :  { %v502_v49 = vrot.slane %v365_v30, %v2340_v36  ;;  %v539_v50 = vsel %vm536_vm2, %v530_v42, %v418_v20  ;;  %v540_v51 = vsel %vm536_vm2, %v531_v43, %v422_v21  ;;  %v546_v52 = vsel %vm545_vm3, %v537_v45, %v450_v24 }
  0x9e   :  { %v547_v53 = vsel %vm545_vm3, %v538_v47, %v454_v25  ;;  %v548_v54 = vsel %vm545_vm3, %v539_v50, %v458_v26  ;;  %v549_v55 = vsel %vm545_vm3, %v540_v51, %v462_v27  ;;  %v555_v56 = vsel %vm554_vm4, %v546_v52, %v490_v28 }
  0x9f   :  { %v556_v57 = vsel %vm554_vm4, %v547_v53, %v494_v31  ;;  %v557_v59 = vsel %vm554_vm4, %v548_v54, %v498_v32  ;;  %v2426_v60 = vsel %vm554_vm4, %v549_v55, %v502_v49  ;;  %v571_v61 = vcombine.high %v555_v56, %v555_v56 }
  0xa0   :  { %v578_v63 = vrot.slane %v555_v56, %v2335_v34  ;;  %v610_v0 = vcombine.high %v556_v57, %v556_v57  ;;  %v617_v1 = vrot.slane %v556_v57, %v2335_v34  ;;  %v649_v3 = vcombine.high %v557_v59, %v557_v59  ;;  %1811 = vperm.xlu1 %2165, %v1808_v35  }
  0xa1   :  { %v585_v4 = vrot.slane %v571_v61, %v2335_v34  ;;  %v656_v5 = vrot.slane %v557_v59, %v2335_v34  ;;  %v688_v6 = vcombine.high %v2426_v60, %v2426_v60  ;;  %v2439_v8 = vrot.slane %v2426_v60, %v2335_v34 }
  0xa2   :  { %v586_v9 = vcombine.high %v578_v63, %v578_v63  ;;  %v593_v10 = vrot.slane %v578_v63, %v2335_v34  ;;  %v624_v11 = vrot.slane %v610_v0, %v2335_v34  ;;  %v625_v12 = vcombine.high %v617_v1, %v617_v1 }
  0xa3   :  { %v600_v13 = vrot.slane %v585_v4, %v2335_v34  ;;  %v632_v14 = vrot.slane %v617_v1, %v2335_v34  ;;  %v663_v15 = vrot.slane %v649_v3, %v2335_v34  ;;  %v664_v16 = vcombine.high %v656_v5, %v656_v5 }
  0xa4   :  { %v607_v18 = vrot.slane %v586_v9, %v2335_v34  ;;  %v639_v19 = vrot.slane %v624_v11, %v2335_v34  ;;  %v646_v20 = vrot.slane %v625_v12, %v2335_v34  ;;  %v671_v21 = vrot.slane %v656_v5, %v2335_v34 }
  0xa5   :  { %v647_v22 = vcombine.high %v632_v14, %v632_v14  ;;  %v678_v23 = vrot.slane %v663_v15, %v2335_v34  ;;  %v685_v24 = vrot.slane %v664_v16, %v2335_v34  ;;  %v703_v25 = vcombine.high %v2439_v8, %v2439_v8 }
  0xa6   :  { %v648_v26 = vcombine.high %v646_v20, %v646_v20  ;;  %v2459_v27 = vrot.slane %v2439_v8, %v2335_v34  ;;  %v883_v28 = vcombine.low %v593_v10, %v607_v18  ;;  %v1903_v29 = vcombine.high %v593_v10, %v607_v18 }
  0xa7   :  { %v885_v30 = vcombine.low %v600_v13, %v632_v14  ;;  %v886_v31 = vcombine.low %v646_v20, %v647_v22  ;;  %v933_v32 = vcombine.low %v671_v21, %v685_v24  ;;  %v1904_v33 = vcombine.high %v671_v21, %v685_v24 }
  0xa8   :  { %v725_v42 = vcombine.high %v2459_v27, %v2459_v27  ;;  %v893_v43 = vrot.slane %v883_v28, %v2335_v34  ;;  %v900_v45 = vrot.slane %v1903_v29, %v2335_v34  ;;  %v932_v47 = vcombine.low %v648_v26, %v639_v19 }
  0xa9   :  { %v907_v49 = vrot.slane %v885_v30, %v2335_v34  ;;  %v914_v50 = vrot.slane %v886_v31, %v2335_v34  ;;  %v935_v51 = vcombine.low %v678_v23, %v2459_v27  ;;  %v949_v52 = vrot.slane %v933_v32, %v2335_v34 }
  0xaa   :  { %v915_v53 = vcombine.low %v893_v43, %v900_v45  ;;  %v942_v54 = vrot.slane %v932_v47, %v2335_v34  ;;  %v956_v55 = vrot.slane %v1904_v33, %v2335_v34  ;;  %v116_v56 = vrot.slane %v102_v41, %v2335_v34 }
  0xab   :  { %v916_v57 = vcombine.low %v907_v49, %v914_v50  ;;  %v963_v59 = vrot.slane %v935_v51, %v2335_v34  ;;  %v176_v61 = vrot.slane %v162_v40, %v2335_v34  ;;  %v228_v62 = vrot.slane %v214_v46, %v2335_v34 }
  0xac   :  { %v923_v63 = vrot.slane %v915_v53, %v2335_v34  ;;  %v964_v0 = vcombine.low %v942_v54, %v949_v52  ;;  %v118_v1 = vcombine.high %v116_v56, %v116_v56  ;;  %v132_v38 = vrot.slane %v116_v56, %v2335_v34 }
  0xad   :  { %v930_v41 = vrot.slane %v916_v57, %v2335_v34  ;;  %v965_v3 = vcombine.low %v956_v55, %v963_v59  ;;  %v178_v4 = vcombine.high %v176_v61, %v176_v61  ;;  %v192_v5 = vrot.slane %v176_v61, %v2335_v34 }
  0xae   :  { %v972_v37 = vrot.slane %v964_v0, %v2335_v34  ;;  %v2493_v40 = vrot.slane %v118_v1, %v2335_v34  ;;  %v148_v9 = vcombine.high %v132_v38, %v132_v38  ;;  %v230_v39 = vcombine.high %v228_v62, %v228_v62 }
  0xaf   :  { %v931_v46 = vcombine.low %v923_v63, %v930_v41  ;;  %v979_v10 = vrot.slane %v965_v3, %v2335_v34  ;;  %v2497_v11 = vrot.slane %v178_v4, %v2335_v34  ;;  %v208_v12 = vcombine.high %v192_v5, %v192_v5 }
  0xb0   :  { %v244_v13 = vrot.slane %v228_v62, %v2335_v34  ;;  %v2501_v14 = vrot.slane %v230_v39, %v2335_v34  ;;  %v280_v15 = vrot.slane %v266_v48, %v2335_v34  ;;  %v332_v16 = vrot.slane %v318_v7, %v2335_v34 }
  0xb1   :  { %v980_v17 = vcombine.low %v972_v37, %v979_v10  ;;  %v386_v18 = vrot.slane %v192_v5, %v2340_v36  ;;  %v390_v19 = vrot.slane %v2497_v11, %v2340_v36  ;;  %v394_v20 = vrot.slane %v208_v12, %v2340_v36 }
  0xb2   :  { %v260_v21 = vcombine.high %v244_v13, %v244_v13  ;;  %v282_v22 = vcombine.high %v280_v15, %v280_v15  ;;  %v296_v23 = vrot.slane %v280_v15, %v2335_v34  ;;  %v334_v24 = vcombine.high %v332_v16, %v332_v16 }
  0xb3   :  { %v2103_v44 = vpack.c.bf16 %v980_v17, %v931_v46  ;;  %v348_v48 = vrot.slane %v332_v16, %v2335_v34  ;;  %v426_v26 = vrot.slane %v244_v13, %v2340_v36  ;;  %v430_v58 = vrot.slane %v2501_v14, %v2340_v36 }
  0xb4   :  { %v2521_v7 = vrot.slane %v282_v22, %v2335_v34  ;;  %v312_v28 = vcombine.high %v296_v23, %v296_v23  ;;  %v2524_v29 = vrot.slane %v334_v24, %v2335_v34  ;;  %v434_v30 = vrot.slane %v260_v21, %v2340_v36 }
  0xb5   :  { %2104 = vmatprep.subr.bf16.mxu0 %v2103_v44  ;;  %v364_v31 = vcombine.high %v348_v48, %v348_v48  ;;  %v466_v32 = vrot.slane %v296_v23, %v2340_v36  ;;  %v506_v33 = vrot.slane %v348_v48, %v2340_v36  ;;  %v532_v35 = vsel %vm527_vm1, %v132_v38, %v386_v18 }
  0xb6   :  { %2106 = vmatpush3.bf16.msra.mxu0 %v2103_v44  ;;  %v470_v43 = vrot.slane %v2521_v7, %v2340_v36  ;;  %v474_v45 = vrot.slane %v312_v28, %v2340_v36  ;;  %v510_v47 = vrot.slane %v2524_v29, %v2340_v36  ;;  %v533_v49 = vsel %vm527_vm1, %v2493_v40, %v390_v19 }
  0xb7   :  { %v514_v50 = vrot.slane %v364_v31, %v2340_v36  ;;  %v534_v51 = vsel %vm527_vm1, %v148_v9, %v394_v20  ;;  %v541_v52 = vsel %vm536_vm2, %v532_v35, %v426_v26  ;;  %v542_v53 = vsel %vm536_vm2, %v533_v49, %v430_v58 }
  0xb8   :  { %v543_v54 = vsel %vm536_vm2, %v534_v51, %v434_v30  ;;  %v550_v55 = vsel %vm545_vm3, %v541_v52, %v466_v32  ;;  %v551_v56 = vsel %vm545_vm3, %v542_v53, %v470_v43  ;;  %v702_v57 = vrot.slane %v688_v6, %v2335_v34 }
  0xb9   :  { %v552_v59 = vsel %vm545_vm3, %v543_v54, %v474_v45  ;;  %v559_v61 = vsel %vm554_vm4, %v550_v55, %v506_v33  ;;  %v560_v62 = vsel %vm554_vm4, %v551_v56, %v510_v47  ;;  %v724_v63 = vrot.slane %v703_v25, %v2335_v34 }
  0xba   :  { %v561_v0 = vsel %vm554_vm4, %v552_v59, %v514_v50  ;;  %v717_v1 = vrot.slane %v702_v57, %v2335_v34  ;;  %v727_v38 = vcombine.high %v559_v61, %v559_v61  ;;  %v734_v41 = vrot.slane %v559_v61, %v2335_v34 }
  0xbb   :  { %v726_v60 = vcombine.high %v724_v63, %v724_v63  ;;  %v766_v6 = vcombine.high %v560_v62, %v560_v62  ;;  %v773_v3 = vrot.slane %v560_v62, %v2335_v34  ;;  %v812_v4 = vrot.slane %v561_v0, %v2335_v34 }
  0xbc   :  { %v741_v5 = vrot.slane %v727_v38, %v2335_v34  ;;  %v742_v37 = vcombine.high %v734_v41, %v734_v41  ;;  %v749_v9 = vrot.slane %v734_v41, %v2335_v34  ;;  %v981_v8 = vcombine.low %v724_v63, %v725_v42 }
  0xbd   :  { %v780_v25 = vrot.slane %v766_v6, %v2335_v34  ;;  %v781_v39 = vcombine.high %v773_v3, %v773_v3  ;;  %v788_v46 = vrot.slane %v773_v3, %v2335_v34  ;;  %v820_v10 = vcombine.high %v812_v4, %v812_v4 }
  0xbe   :  { %v756_v12 = vrot.slane %v741_v5, %v2335_v34  ;;  %v763_v13 = vrot.slane %v742_v37, %v2335_v34  ;;  %v827_v15 = vrot.slane %v812_v4, %v2335_v34  ;;  %v982_v16 = vcombine.low %v726_v60, %v717_v1 }
  0xbf   :  { %v795_v17 = vrot.slane %v780_v25, %v2335_v34  ;;  %v802_v18 = vrot.slane %v781_v39, %v2335_v34  ;;  %v803_v19 = vcombine.high %v788_v46, %v788_v46  ;;  %v841_v27 = vrot.slane %v820_v10, %v2335_v34 }
  0xc0   :  { %v983_v42 = vcombine.low %v749_v9, %v763_v13  ;;  %v1905_v20 = vcombine.high %v749_v9, %v763_v13  ;;  %v991_v21 = vrot.slane %v981_v8, %v2335_v34  ;;  %v998_v22 = vrot.slane %v982_v16, %v2335_v34 }
  0xc1   :  { %v804_v23 = vcombine.high %v802_v18, %v802_v18  ;;  %v1030_v24 = vcombine.low %v756_v12, %v788_v46  ;;  %v1031_v44 = vcombine.low %v802_v18, %v803_v19  ;;  %v1033_v48 = vcombine.low %v827_v15, %v841_v27 }
  0xc2   :  { %v1005_v26 = vrot.slane %v983_v42, %v2335_v34  ;;  %v1012_v58 = vrot.slane %v1905_v20, %v2335_v34  ;;  %v1013_v28 = vcombine.low %v991_v21, %v998_v22  ;;  %v210_v45 = vcombine.high %v2497_v11, %v2497_v11  ;;  %v92_v21 = vld [vmem:[%s2742_s1 + $0x8] sm:$0xff]  ;;  %v93_v22 = vld [vmem:[%s2742_s1 + $0x10] sm:$0xff] }
  0xc3   :  { %v1032_v30 = vcombine.low %v804_v23, %v795_v17  ;;  %v1040_v31 = vrot.slane %v1030_v24, %v2335_v34  ;;  %v1047_v32 = vrot.slane %v1031_v44, %v2335_v34  ;;  %v1061_v33 = vrot.slane %v1033_v48, %v2335_v34  ;;  %v94_v23 = vld [vmem:[%s2742_s1 + $0x18] sm:$0xff]  ;;  %v96_v24 = vld [vmem:[%s2742_s1 + $0x28] sm:$0xff]  ;;  %v97_v44 = vld [vmem:[%s2742_s1 + $0x30] sm:$0xff] }
  0xc4   :  { %v1014_v35 = vcombine.low %v1005_v26, %v1012_v58  ;;  %v1021_v43 = vrot.slane %v1013_v28, %v2335_v34  ;;  %v262_v47 = vcombine.high %v2501_v14, %v2501_v14  ;;  %v314_v51 = vcombine.high %v2521_v7, %v2521_v7  ;;  %v98_v48 = vld [vmem:[%s2742_s1 + $0x38] sm:$0xff]  ;;  %v1294_v26 = vld [vmem:[%s2744_s3] sm:$0xff]  ;;  %v1266_v58 = vpop.permute.xlu1 %1265 }
  0xc5   :  { %v1054_v49 = vrot.slane %v1032_v30, %v2335_v34  ;;  %v1062_v50 = vcombine.low %v1040_v31, %v1047_v32  ;;  %v366_v52 = vcombine.high %v2524_v29, %v2524_v29  ;;  %v150_v53 = vcombine.high %v2493_v40, %v2493_v40  ;;  %2042 = vmatprep.mubr.msk.f32.mxu1 %vm1317_vm5, %v1294_v26 }
  0xc6   :  { %v398_v54 = vrot.slane %v210_v45, %v2340_v36  ;;  %v438_v55 = vrot.slane %v262_v47, %v2340_v36  ;;  %v805_v11 = vcombine.high %v561_v0, %v561_v0  ;;  %v1028_v56 = vrot.slane %v1014_v35, %v2335_v34 }
  0xc7   :  { %v1063_v14 = vcombine.low %v1054_v49, %v1061_v33  ;;  %v1070_v57 = vrot.slane %v1062_v50, %v2335_v34  ;;  %v478_v59 = vrot.slane %v314_v51, %v2340_v36  ;;  %v518_v40 = vrot.slane %v366_v52, %v2340_v36 }
  0xc8   :  { %v535_v7 = vsel %vm527_vm1, %v150_v53, %v398_v54  ;;  %v819_v61 = vrot.slane %v805_v11, %v2335_v34  ;;  %v1029_v29 = vcombine.low %v1021_v43, %v1028_v56  ;;  %v1906_v4 = vcombine.high %v827_v15, %v841_v27 }
  0xc9   :  { %v1077_v62 = vrot.slane %v1063_v14, %v2335_v34  ;;  %v544_v63 = vsel %vm536_vm2, %v535_v7, %v438_v55 }
  0xca   :  { %v553_v0 = vsel %vm545_vm3, %v544_v63, %v478_v59  ;;  %v834_v41 = vrot.slane %v819_v61, %v2335_v34  ;;  %v1089_v39 = vrot.slane %v1906_v4, %v2335_v34  ;;  %v1299_v4 = vld [vmem:[%s2744_s3 + $0x28] sm:$0xff] }
  0xcb   :  { %v1078_v1 = vcombine.low %v1070_v57, %v1077_v62  ;;  %v562_v38 = vsel %vm554_vm4, %v553_v0, %v518_v40 }
  0xcc   :  { %v844_v60 = vcombine.high %v562_v38, %v562_v38  ;;  %v851_v6 = vrot.slane %v562_v38, %v2335_v34 }
  0xcd   :  { %v2107_v3 = vpack.c.bf16 %v1078_v1, %v1029_v29 }
  0xce   :  { %v858_v5 = vrot.slane %v844_v60, %v2335_v34  ;;  %v859_v37 = vcombine.high %v851_v6, %v851_v6  ;;  %v866_v9 = vrot.slane %v851_v6, %v2335_v34  ;;  %v1296_v60 = vld [vmem:[%s2744_s3 + $0x10] sm:$0xff]  ;;  %v1297_v6 = vld [vmem:[%s2744_s3 + $0x18] sm:$0xff] }
  0xcf   :  { %2108 = vmatprep.subr.bf16.mxu0 %v2107_v3 }
  0xd0   :  { %2110 = vmatpush3.bf16.msra.mxu0 %v2107_v3  ;;  %v880_v36 = vrot.slane %v859_v37, %v2335_v34  ;;  %v881_v8 = vcombine.high %v866_v9, %v866_v9  ;;  %v1080_v25 = vcombine.low %v834_v41, %v866_v9  ;;  %v873_v46 = vrot.slane %v858_v5, %v2335_v34  ;;  %v1295_v41 = vld [vmem:[%s2744_s3 + $0x8] sm:$0xff]  ;;  %v1298_v3 = vld [vmem:[%s2744_s3 + $0x20] sm:$0xff]  ;;  %v1300_v5 = vld [vmem:[%s2744_s3 + $0x30] sm:$0xff] }
  0xd1   :  { %v1301_v37 = vld [vmem:[%s2744_s3 + $0x38] sm:$0xff]  ;;  %v1483_v9 = vld [vmem:[%s2746_s5] sm:$0xff] }
  0xd2   :  { %v882_v10 = vcombine.high %v880_v36, %v880_v36  ;;  %v1081_v12 = vcombine.low %v880_v36, %v881_v8  ;;  %v1096_v13 = vrot.slane %v1080_v25, %v2335_v34  ;;  %v1450_v36 = vpop.permute.xlu1 %1449 }
  0xd4   :  { %v1082_v15 = vcombine.low %v882_v10, %v873_v46  ;;  %v1103_v16 = vrot.slane %v1081_v12, %v2335_v34  ;;  %v1111_v18 = vcombine.low %v1089_v39, %v1096_v13 }
  0xd6   :  { %v1110_v17 = vrot.slane %v1082_v15, %v2335_v34  ;;  %v1119_v27 = vrot.slane %v1111_v18, %v2335_v34  ;;  %v1455_v39 = vpop.permute.xlu1 %1454 }
  0xd8   :  { %v1112_v19 = vcombine.low %v1103_v16, %v1110_v17 }
  0xda   :  { %v1126_v42 = vrot.slane %v1112_v19, %v2335_v34  ;;  %v95_v34 = vld [vmem:[%s2742_s1 + $0x20] sm:$0xff] }
  0xdc   :  { %v1127_v20 = vcombine.low %v1119_v27, %v1126_v42 }
  0xde   :  { %2004 = vmatprep.subr.mxu0 %v1127_v20 }
  0xdf   :  { %2005 = vmatpush3.msra.mxu0 %v1127_v20 }
  0xe0   :  { %2007 = vmatmul.mubr.msk.f32.vlgmr.msra.gmra.mrb[0].mxu0 %vm1133_vm0, %v92_v21 }
  0xe1   :  { %2009 = vmatprep.mubr.msk.f32.mxu0 %vm1133_vm0, %v93_v22 }
  0xe4   :  { %2010 = vmatmul.mubr.msk.f32.gmra.mrb[2].mxu0 %vm1133_vm0, %v94_v23 }
  0xe5   :  { %2012 = vmatprep.mubr.msk.f32.mxu0 %vm1133_vm0, %v95_v34 }
  0xe8   :  { %2013 = vmatmul.mubr.msk.f32.gmra.mrb[4].mxu0 %vm1133_vm0, %v96_v24 }
  0xe9   :  { %2015 = vmatprep.mubr.msk.f32.mxu0 %vm1133_vm0, %v97_v44 }
  0xec   :  { %2016 = vmatmul.mubr.msk.f32.gmra.mrb[6].mxu0 %vm1133_vm0, %v98_v48 }
  0xed   :  { %2058 = vmatprep.mubr.msk.f32.mxu0 %vm1511_vm6, %v1483_v9  ;;  %v1619_v9 = vld [vmem:[%s2748_s7 + $0x30] sm:$0xff] }
 0x1b3   :  { %v2008_v28 = vpop.f32.mrb[0].mxu0 }
 0x1b4   :  { %v1269_v30 = vadd.f32 %v2008_v28, %v1266_v58  ;;  %v1224_v31 = vpop.f32.mrb[1].mxu0 }
 0x1b5   :  { %v1268_v32 = vadd.f32 %v1266_v58, %v1224_v31 }
 0x1b6   :  { %v1277_v33 = vmax.f32 %v1269_v30, 0.0 }
 0x1b7   :  { %v1276_v35 = vmax.f32 %v1268_v32, 0.0  ;;  %v2011_v43 = vpop.f32.mrb[2].mxu0 }
 0x1b8   :  { %v1271_v45 = vadd.f32 %v2011_v43, %v1266_v58  ;;  %v1234_v47 = vpop.f32.mrb[3].mxu0  ;;  %v2115_v52 = vpack.c.bf16 %v1277_v33, %v1277_v33 }
 0x1b9   :  { %v1270_v49 = vadd.f32 %v1266_v58, %v1234_v47  ;;  %v2111_v50 = vpack.c.bf16 %v1276_v35, %v2191_v2 }
 0x1ba   :  { %v1279_v51 = vmax.f32 %v1271_v45, 0.0 }
 0x1bb   :  { %v1278_v53 = vmax.f32 %v1270_v49, 0.0  ;;  %v2014_v54 = vpop.f32.mrb[4].mxu0  ;;  %2112 = vmatprep.subr.bf16.mxu1 %v2111_v50 }
 0x1bc   :  { %v1244_v55 = vpop.f32.mrb[5].mxu0  ;;  %2114 = vmatpush3.bf16.msra.mxu1 %v2111_v50  ;;  %v1273_v14 = vadd.f32 %v2014_v54, %v1266_v58  ;;  %v1484_v50 = vld [vmem:[%s2746_s5 + $0x8] sm:$0xff]  ;;  %v1494_v54 = vpop.permute.xlu1 %1493 }
 0x1bd   :  { %v2119_v11 = vpack.c.bf16 %v1279_v51, %v1278_v53  ;;  %v1272_v56 = vadd.f32 %v1266_v58, %v1244_v55  ;;  %2116 = vmatprep.subr.bf16.mxu1 %v2115_v52  ;;  %v1613_v53 = vld [vmem:[%s2748_s7] sm:$0xff] }
 0x1be   :  { %v1281_v63 = vmax.f32 %v1273_v14, 0.0 }
 0x1bf   :  { %v1280_v57 = vmax.f32 %v1272_v56, 0.0  ;;  %v2017_v59 = vpop.f32.mrb[6].mxu0 }
 0x1c0   :  { %v1275_v7 = vadd.f32 %v2017_v59, %v1266_v58  ;;  %v1254_v61 = vpop.f32.mrb[7].mxu0  ;;  %2118 = vmatpush3.bf16.msra.mxu1 %v2115_v52  ;;  %v2127_v38 = vpack.c.bf16 %v1281_v63, %v1281_v63  ;;  %v1486_v52 = vld [vmem:[%s2746_s5 + $0x18] sm:$0xff]  ;;  %v1499_v55 = vpop.permute.xlu1 %1498 }
 0x1c1   :  { %v2123_v29 = vpack.c.bf16 %v1280_v57, %v1279_v51  ;;  %v1274_v62 = vadd.f32 %v1266_v58, %v1254_v61  ;;  %2120 = vmatprep.subr.bf16.mxu1 %v2119_v11  ;;  %v1485_v51 = vld [vmem:[%s2746_s5 + $0x10] sm:$0xff] }
 0x1c2   :  { %v1283_v40 = vmax.f32 %v1275_v7, 0.0 }
 0x1c3   :  { %v1282_v0 = vmax.f32 %v1274_v62, 0.0 }
 0x1c4   :  { %2122 = vmatpush3.bf16.msra.mxu1 %v2119_v11  ;;  %v1504_v11 = vpop.permute.xlu1 %1503 }
 0x1c5   :  { %v2131_v1 = vpack.c.bf16 %v1283_v40, %v1282_v0  ;;  %2124 = vmatprep.subr.bf16.mxu1 %v2123_v29 }
 0x1c8   :  { %2126 = vmatpush3.bf16.msra.mxu1 %v2123_v29  ;;  %v1509_v61 = vpop.permute.xlu1 %1508 }
 0x1c9   :  { %2128 = vmatprep.subr.bf16.mxu1 %v2127_v38 }
 0x1cc   :  { %2130 = vmatpush3.bf16.msra.mxu1 %v2127_v38 }
 0x1cd   :  { %2132 = vmatprep.subr.bf16.mxu1 %v2131_v1 }
 0x1d0   :  { %2134 = vmatpush3.bf16.msra.mxu1 %v2131_v1 }
 0x1d3   :  { %2043 = vmatmul.mubr.msk.f32.vlgmr.msra.gmra.mrb[0].mxu1 %vm1317_vm5, %v1295_v41 }
 0x1d4   :  { %2045 = vmatprep.mubr.msk.f32.mxu1 %vm1317_vm5, %v1296_v60 }
 0x1d7   :  { %2046 = vmatmul.mubr.msk.f32.gmra.mrb[2].mxu1 %vm1317_vm5, %v1297_v6  ;;  %v1614_v6 = vld [vmem:[%s2748_s7 + $0x8] sm:$0xff] }
 0x1d8   :  { %2048 = vmatprep.mubr.msk.f32.mxu1 %vm1317_vm5, %v1298_v3  ;;  %v1615_v3 = vld [vmem:[%s2748_s7 + $0x10] sm:$0xff] }
 0x1db   :  { %2049 = vmatmul.mubr.msk.f32.gmra.mrb[4].mxu1 %vm1317_vm5, %v1299_v4  ;;  %v1616_v4 = vld [vmem:[%s2748_s7 + $0x18] sm:$0xff] }
 0x1dc   :  { %2051 = vmatprep.mubr.msk.f32.mxu1 %vm1317_vm5, %v1300_v5  ;;  %v1617_v5 = vld [vmem:[%s2748_s7 + $0x20] sm:$0xff] }
 0x1df   :  { %2052 = vmatmul.mubr.msk.f32.gmra.mrb[6].mxu1 %vm1317_vm5, %v1301_v37  ;;  %v1618_v37 = vld [vmem:[%s2748_s7 + $0x28] sm:$0xff] }
 0x1e0   :  { %2100 = vmatprep.mubr.msk.f32.mxu1 %vm2195_vm8, %v2191_v2 }
 0x2a6   :  { %v2044_v8 = vpop.f32.mrb[0].mxu1 }
 0x2a7   :  { %v1408_v25 = vpop.f32.mrb[1].mxu1  ;;  %v1458_v46 = vadd.f32 %v2044_v8, %v1455_v39  ;;  %v2194_v8 = vmov 0.0|0.0  }
 0x2a8   :  { %v1457_v10 = vadd.f32 %v1450_v36, %v1408_v25  ;;  %2147 = vmatprep.subr.bf16.mxu1 %v2194_v8  ;;  %v1632_v25 = vpop.permute.xlu1 %1631 }
 0x2a9   :  { %v1466_v17 = vmax.f32 %v1458_v46, 0.0 }
 0x2aa   :  { %v2047_v12 = vpop.f32.mrb[2].mxu1  ;;  %v1465_v19 = vmax.f32 %v1457_v10, 0.0 }
 0x2ab   :  { %v1460_v13 = vadd.f32 %v2047_v12, %v1455_v39  ;;  %v1418_v15 = vpop.f32.mrb[3].mxu1 }
 0x2ac   :  { %v1459_v16 = vadd.f32 %v1450_v36, %v1418_v15 }
 0x2ad   :  { %v1468_v18 = vmax.f32 %v1460_v13, 0.0 }
 0x2ae   :  { %v1467_v27 = vmax.f32 %v1459_v16, 0.0  ;;  %v2050_v42 = vpop.f32.mrb[4].mxu1 }
 0x2af   :  { %v1476_v20 = vadd.f32 %v1468_v18, %v1466_v17  ;;  %v1462_v21 = vadd.f32 %v2050_v42, %v1455_v39  ;;  %v1428_v22 = vpop.f32.mrb[5].mxu1 }
 0x2b0   :  { %v1473_v23 = vadd.f32 %v1467_v27, %v1465_v19  ;;  %v1461_v34 = vadd.f32 %v1450_v36, %v1428_v22 }
 0x2b1   :  { %v1470_v24 = vmax.f32 %v1462_v21, 0.0 }
 0x2b2   :  { %v1469_v44 = vmax.f32 %v1461_v34, 0.0  ;;  %v2053_v48 = vpop.f32.mrb[6].mxu1 }
 0x2b3   :  { %v1477_v26 = vadd.f32 %v1476_v20, %v1470_v24  ;;  %v1464_v58 = vadd.f32 %v2053_v48, %v1455_v39  ;;  %v1438_v28 = vpop.f32.mrb[7].mxu1  ;;  %v1637_v39 = vpop.permute.xlu1 %1636 }
 0x2b4   :  { %v1474_v30 = vadd.f32 %v1473_v23, %v1469_v44  ;;  %v1463_v31 = vadd.f32 %v1450_v36, %v1438_v28  ;;  %v1620_v36 = vld [vmem:[%s2748_s7 + $0x38] sm:$0xff] }
 0x2b5   :  { %v1472_v32 = vmax.f32 %v1464_v58, 0.0 }
 0x2b6   :  { %v1471_v33 = vmax.f32 %v1463_v31, 0.0 }
 0x2b7   :  { %v1478_v35 = vadd.f32 %v1477_v26, %v1472_v32  ;;  %v1642_v46 = vpop.permute.xlu1 %1641 }
 0x2b8   :  { %v1475_v43 = vadd.f32 %v1474_v30, %v1471_v33 }
 0x2b9   :  { %v1482_v45 = vmul.f32 0.25, %v1478_v35 }
 0x2ba   :  { %v1481_v47 = vmul.f32 0.25, %v1475_v43 }
 0x2bb   :  { %v1647_v10 = vpop.permute.xlu1 %1646 }
 0x2bc   :  { %v2135_v49 = vpack.c.bf16 %v1482_v45, %v1481_v47 }
 0x2be   :  { %2136 = vmatprep.subr.bf16.mxu0 %v2135_v49 }
 0x2bf   :  { %2138 = vmatpush3.bf16.msra.mxu0 %v2135_v49  ;;  %v1652_v12 = vpop.permute.xlu1 %1651 }
 0x2c2   :  { %2059 = vmatmul.mubr.msk.f32.vlgmr.msra.gmra.mrb[8].mxu0 %vm1511_vm6, %v1484_v50 }
 0x2c3   :  { %2061 = vmatprep.mubr.msk.f32.mxu0 %vm1511_vm6, %v1485_v51  ;;  %v1657_v13 = vpop.permute.xlu1 %1656 }
 0x2c6   :  { %2062 = vmatmul.mubr.msk.f32.gmra.mrb[10].mxu0 %vm1511_vm6, %v1486_v52  ;;  %v1807_v52 = vld [vmem:[%s2750_s9] sm:$0x3f] }
 0x2c7   :  { %2072 = vmatprep.mubr.msk.f32.mxu0 %vm1669_vm7, %v1613_v53  ;;  %v1662_v22 = vpop.permute.xlu1 %1661 }
 0x2cb   :  { %v1667_v31 = vpop.permute.xlu1 %1666 }
 0x2cf   :  { %v1812_v53 = vpop.permute.xlu1 %1811 }
 0x395   :  { %v2060_v56 = vpop.f32.mrb[8].mxu0 }
 0x396   :  { %v1596_v14 = vadd.f32 %v2060_v56, %v1499_v55  ;;  %v1590_v57 = vpop.f32.mrb[9].mxu0 }
 0x397   :  { %v1591_v59 = vadd.f32 %v1590_v57, %v1494_v54 }
 0x398   :  { %v1610_v7 = vmax.f32 %v1596_v14, 0.0 }
 0x399   :  { %v1609_v29 = vmax.f32 %v1591_v59, 0.0  ;;  %v2063_v62 = vpop.f32.mrb[10].mxu0 }
 0x39a   :  { %v1606_v40 = vadd.f32 %v2063_v62, %v1509_v61  ;;  %v1600_v63 = vpop.f32.mrb[11].mxu0 }
 0x39b   :  { %v2139_v0 = vpack.c.bf16 %v1610_v7, %v1609_v29  ;;  %v1601_v1 = vadd.f32 %v1600_v63, %v1504_v11 }
 0x39c   :  { %v1612_v38 = vmax.f32 %v1606_v40, 0.0 }
 0x39d   :  { %v1611_v41 = vmax.f32 %v1601_v1, 0.0  ;;  %2140 = vmatprep.subr.bf16.mxu0 %v2139_v0 }
 0x39e   :  { %2142 = vmatpush3.bf16.msra.mxu0 %v2139_v0 }
 0x39f   :  { %v2143_v60 = vpack.c.bf16 %v1612_v38, %v1611_v41 }
 0x3a1   :  { %2144 = vmatprep.subr.bf16.mxu0 %v2143_v60 }
 0x3a2   :  { %2146 = vmatpush3.bf16.msra.mxu0 %v2143_v60 }
 0x3a5   :  { %2073 = vmatmul.mubr.msk.f32.vlgmr.msra.gmra.mrb[12].mxu0 %vm1669_vm7, %v1614_v6 }
 0x3a6   :  { %2075 = vmatprep.mubr.msk.f32.mxu0 %vm1669_vm7, %v1615_v3 }
 0x3a9   :  { %2076 = vmatmul.mubr.msk.f32.gmra.mrb[14].mxu0 %vm1669_vm7, %v1616_v4 }
 0x3aa   :  { %2078 = vmatprep.mubr.msk.f32.mxu0 %vm1669_vm7, %v1617_v5 }
 0x3ad   :  { %2079 = vmatmul.mubr.msk.f32.gmra.mrb[16].mxu0 %vm1669_vm7, %v1618_v37 }
 0x3ae   :  { %2081 = vmatprep.mubr.msk.f32.mxu0 %vm1669_vm7, %v1619_v9 }
 0x3b1   :  { %2082 = vmatmul.mubr.msk.f32.gmra.mrb[18].mxu0 %vm1669_vm7, %v1620_v36 }
 0x478   :  { %v2074_v15 = vpop.f32.mrb[12].mxu0 }
 0x479   :  { %v1766_v16 = vadd.f32 %v2074_v15, %v1637_v39  ;;  %v1760_v17 = vpop.f32.mrb[13].mxu0 }
 0x47a   :  { %v1761_v18 = vadd.f32 %v1760_v17, %v1632_v25 }
 0x47b   :  { %v1800_v19 = vmax.f32 %v1766_v16, 0.0 }
 0x47c   :  { %v1799_v27 = vmax.f32 %v1761_v18, 0.0  ;;  %v2077_v42 = vpop.f32.mrb[14].mxu0 }
 0x47d   :  { %v1776_v20 = vadd.f32 %v2077_v42, %v1647_v10  ;;  %v1770_v21 = vpop.f32.mrb[15].mxu0 }
 0x47e   :  { %v2148_v23 = vpack.c.bf16 %v1800_v19, %v1799_v27  ;;  %v1771_v34 = vadd.f32 %v1770_v21, %v1642_v46 }
 0x47f   :  { %v1802_v24 = vmax.f32 %v1776_v20, 0.0 }
 0x480   :  { %v1801_v2 = vmax.f32 %v1771_v34, 0.0  ;;  %v2080_v44 = vpop.f32.mrb[16].mxu0  ;;  %2149 = vmatpush3.bf16.msra.mxu1 %v2148_v23 }
 0x481   :  { %v1786_v48 = vadd.f32 %v2080_v44, %v1657_v13  ;;  %v1780_v26 = vpop.f32.mrb[17].mxu0  ;;  %2150 = vmatprep.subr.bf16.mxu1 %v2194_v8 }
 0x482   :  { %v2151_v58 = vpack.c.bf16 %v1802_v24, %v1801_v2  ;;  %v1781_v28 = vadd.f32 %v1780_v26, %v1652_v12 }
 0x483   :  { %v1804_v30 = vmax.f32 %v1786_v48, 0.0 }
 0x484   :  { %v1803_v32 = vmax.f32 %v1781_v28, 0.0  ;;  %v2083_v33 = vpop.f32.mrb[18].mxu0  ;;  %2152 = vmatpush3.bf16.msra.mxu1 %v2151_v58 }
 0x485   :  { %v1796_v35 = vadd.f32 %v2083_v33, %v1667_v31  ;;  %v1790_v43 = vpop.f32.mrb[19].mxu0  ;;  %2153 = vmatprep.subr.bf16.mxu1 %v2194_v8 }
 0x486   :  { %v2154_v45 = vpack.c.bf16 %v1804_v30, %v1803_v32  ;;  %v1791_v47 = vadd.f32 %v1790_v43, %v1662_v22 }
 0x487   :  { %v1806_v49 = vmax.f32 %v1796_v35, 0.0 }
 0x488   :  { %v1805_v50 = vmax.f32 %v1791_v47, 0.0  ;;  %2155 = vmatpush3.bf16.msra.mxu1 %v2154_v45 }
 0x489   :  { %2156 = vmatprep.subr.bf16.mxu1 %v2194_v8 }
 0x48a   :  { %v2157_v51 = vpack.c.bf16 %v1806_v49, %v1805_v50 }
 0x48c   :  { %2158 = vmatpush3.bf16.msra.mxu1 %v2157_v51 }
 0x48f   :  { %2101 = vmatmul.mubr.msk.f32.vlgmr.msra.gmra.mrb[8].mxu1 %vm1814_vm9, %v1807_v52 }
 0x562   :  { %v1884_v54 = vpop.f32.mrb[8].mxu1 }
 0x563   :  { %v1885_v55 = vadd.f32 %v1884_v54, %v1812_v53  ;;  %v2102_v11 = vpop.f32.mrb[9].mxu1 }
 0x565   :  { %1888 = vst [vmem:[#allocation4] sm:$0x3f] %v1885_v55 }
 0x566   :  { %2178 = shalt.err (!%p2175_p4)
}
 0x567   :  { %s2179_s9 = scalar_lea.hbm %s2752_s11, 128 }
 0x568   :  { %p2180_p5 = scmp.ne.s32.totalorder %s2752_s11, %s2179_s9  ;;  %p2183_p6 = scmp.lt.u32.totalorder %s2179_s9, %s2752_s11 }
 0x56a   :  { %p2185_p7 = pnand %p2183_p6, %p2180_p5 }
 0x56c   :  { %2188 = shalt.err (!%p2185_p7)
}
 0x56d   :  { %1898 = dma.vmem_to_hbm [thread:$0]  %s1896_s20, 128, %s2752_s11, [#allocation5]  }
 0x56e   :  { %2189 = dma.done.wait [#allocation5], 128  }
 0x56f   :  { %2190 = vsyncadd [#allocation5], 4294967168 }
 0x570   :  { %1902 = vsyncpa [#allocation5], 1 }

</bundles_post_ra>
